<compile_context>
chip_gen: v6e
topology: v6e:2x2x1
jax: 0.10.0
libtpu: 0.0.40
codegen_flags: <defaults>
</compile_context>

<pallas_src>
import jax
import jax.numpy as jnp
from jax.experimental import pallas as pl
from jax.experimental.pallas import tpu as pltpu

_LANE = 128          # lane-dense pad unit (128 lanes; use 256 to fill v6e/v7x 256^2 MXU)
_BN_EPS = 1e-5


def _pad_up(n, m=_LANE):
    return ((n + m - 1) // m) * m


# ---------------------------------------------------------------------------
# Fused Pallas kernel (built per layer structure, unrolled at trace time)
# ---------------------------------------------------------------------------

def _make_fused_encoder_kernel(kinds, compute_dtype, eps=_BN_EPS):
    """kinds: tuple of 'linear_bn_relu' / 'linear', one entry per Linear layer.

    Kernel ref order: x_ref, then per layer (w_ref, aux_or_bias_ref), then o_ref.
      - 'linear_bn_relu': aux is (3, Dout_pad) f32 = [bias; gamma; beta]
      - 'linear'        : bias is (1, Dout_pad) f32
    Weights are (Din_pad, Dout_pad) in compute_dtype (bf16), zero padded.
    """
    n_layers = len(kinds)

    def kernel(*refs):
        o_ref = refs[-1]
        h = refs[0][...]                                   # (B, Din_pad) compute_dtype
        idx = 1
        for li, kind in enumerate(kinds):
            w_ref = refs[idx]
            vec_ref = refs[idx + 1]
            idx += 2
            # MXU matmul: bf16 operands, f32 accumulation.
            y = jnp.dot(h, w_ref[...], preferred_element_type=jnp.float32)
            if kind == "linear_bn_relu":
                aux = vec_ref[...]                         # (3, Dout_pad) f32
                y = y + aux[0:1, :]                        # + bias
                # BatchNorm1d (training mode, biased variance) folded to scale/shift.
                mean = jnp.mean(y, axis=0, keepdims=True)
                var = jnp.mean(y * y, axis=0, keepdims=True) - mean * mean
                scale = aux[1:2, :] * jax.lax.rsqrt(var + eps)   # gamma * rsqrt
                shift = aux[2:3, :] - mean * scale               # beta - mean*scale
                h = jnp.maximum(y * scale + shift, 0.0)          # ReLU, f32
                h = h.astype(compute_dtype)                      # bf16 for next MXU pass
            else:
                h = y + vec_ref[...]                             # plain Linear, f32
                if li != n_layers - 1:
                    h = h.astype(compute_dtype)
        o_ref[...] = h.astype(o_ref.dtype)                 # single lane-dense f32 store

    return kernel


# ---------------------------------------------------------------------------
# Parameter construction (mirrors torch defaults) and forward wrapper
# ---------------------------------------------------------------------------

def init_fc_encoder_params(key, input_dim, latent_dim, hid_dims):
    """nn.Linear default init (uniform(-1/sqrt(in), 1/sqrt(in))); BN gamma=1, beta=0.

    Weights are stored as (in_dim, out_dim) == torch weight.T so y = x @ W + b.
    BN+ReLU attached iff out_dim != latent_dim (exactly as in the torch module).
    """
    dims = [input_dim] + list(hid_dims) + [latent_dim]
    params = []
    for in_dim, out_dim in zip(dims, dims[1:]):
        key, kw, kb = jax.random.split(key, 3)
        bound = 1.0 / jnp.sqrt(jnp.float32(in_dim))
        w = jax.random.uniform(kw, (in_dim, out_dim), jnp.float32, -bound, bound)
        b = jax.random.uniform(kb, (out_dim,), jnp.float32, -bound, bound)
        if out_dim != latent_dim:
            gamma = jnp.ones((out_dim,), jnp.float32)
            beta = jnp.zeros((out_dim,), jnp.float32)
            params.append(("linear_bn_relu", w, b, gamma, beta))
        else:
            params.append(("linear", w, b))
    return params


def fc_encoder_forward(params, x, *, compute_dtype=jnp.bfloat16, lane=_LANE):
    """Single fused pallas_call for the whole encoder. Returns (batch, latent_dim) f32."""
    batch, in_dim = x.shape
    in_pad = _pad_up(in_dim, lane)
    x_pad = jnp.pad(x, ((0, 0), (0, in_pad - in_dim))).astype(compute_dtype)

    inputs = [x_pad]
    kinds = []
    prev_pad = in_pad
    for layer in params:
        kind, w = layer[0], layer[1]
        din, dout = w.shape
        din_pad, dout_pad = _pad_up(din, lane), _pad_up(dout, lane)
        assert din_pad == prev_pad, "layer input dim mismatch"
        w_pad = jnp.pad(w, ((0, din_pad - din), (0, dout_pad - dout))).astype(compute_dtype)
        if kind == "linear_bn_relu":
            _, _, b, gamma, beta = layer
            aux = jnp.stack(
                [jnp.pad(b, (0, dout_pad - dout)),
                 jnp.pad(gamma, (0, dout_pad - dout)),
                 jnp.pad(beta, (0, dout_pad - dout))],
                axis=0,
            ).astype(jnp.float32)                              # (3, Dout_pad)
            inputs += [w_pad, aux]
        else:
            _, _, b = layer
            b_pad = jnp.pad(b, (0, dout_pad - dout)).astype(jnp.float32).reshape(1, -1)
            inputs += [w_pad, b_pad]
        kinds.append(kind)
        prev_pad = dout_pad

    out_true_dim = params[-1][1].shape[1]
    out_shape = jax.ShapeDtypeStruct((batch, prev_pad), jnp.float32)

    kernel = _make_fused_encoder_kernel(tuple(kinds), compute_dtype)
    # No grid: everything (a few KiB here) fits one VMEM block; whole-array BlockSpecs.
    in_specs = [pl.BlockSpec(a.shape, lambda *_, n=a.ndim: (0,) * n) for a in inputs]
    out_specs = pl.BlockSpec(out_shape.shape, lambda *_: (0, 0))

    result = pl.pallas_call(
        kernel,
        out_shape=out_shape,
        in_specs=in_specs,
        out_specs=out_specs,
        compiler_params=pltpu.CompilerParams(
            vmem_limit_bytes=32 * 1024 * 1024,   # safe on v5e/v6e (128 MiB) and v7x (64 MiB)
        ),
    )(*inputs)
    return result[:, :out_true_dim]


# ---------------------------------------------------------------------------
# References
# ---------------------------------------------------------------------------

def fc_encoder_reference_f32(params, x, eps=_BN_EPS):
    """Pure-JAX f32 reference matching the PyTorch module (training-mode BN)."""
    h = x
    for layer in params:
        kind, w = layer[0], layer[1]
        if kind == "linear_bn_relu":
            _, _, b, gamma, beta = layer
            y = h @ w + b
            mean = jnp.mean(y, axis=0, keepdims=True)
            var = jnp.mean(jnp.square(y - mean), axis=0, keepdims=True)
            y = (y - mean) * jax.lax.rsqrt(var + eps)
            h = jnp.maximum(y * gamma + beta, 0.0)
        else:
            _, _, b = layer
            h = h @ w + b
    return h


def fc_encoder_reference_kernel_math(params, x, compute_dtype=jnp.bfloat16, eps=_BN_EPS):
    """Mirrors the kernel's exact math (bf16 MXU inputs, f32 accumulation, fused BN)."""
    h = x.astype(compute_dtype)
    n = len(params)
    for i, layer in enumerate(params):
        kind, w = layer[0], layer[1]
        y = jnp.dot(h, w.astype(compute_dtype), preferred_element_type=jnp.float32)
        if kind == "linear_bn_relu":
            _, _, b, gamma, beta = layer
            y = y + b
            mean = jnp.mean(y, axis=0, keepdims=True)
            var = jnp.mean(y * y, axis=0, keepdims=True) - mean * mean
            scale = gamma * jax.lax.rsqrt(var + eps)
            shift = beta - mean * scale
            h = jnp.maximum(y * scale + shift, 0.0).astype(compute_dtype)
        else:
            _, _, b = layer
            h = y + b
            if i != n - 1:
                h = h.astype(compute_dtype)
    return h


if __name__ == "__main__":
    # Shapes consistent with FcEncoder(input_dim=32, latent_dim=8, hid_dims=[64, 32])
    batch, input_dim, latent_dim, hid_dims = 8, 32, 8, [64, 32]

    key = jax.random.PRNGKey(0)
    k_params, k_x = jax.random.split(key)
    params = init_fc_encoder_params(k_params, input_dim, latent_dim, hid_dims)
    x = jax.random.normal(k_x, (batch, input_dim), jnp.float32)

    out = jax.block_until_ready(fc_encoder_forward(params, x))
    assert out.shape == (batch, latent_dim)

    # Tight check: kernel vs a pure-JAX mirror of the same (bf16-MXU) math.
    ref_k = fc_encoder_reference_kernel_math(params, x)
    assert jnp.allclose(out, ref_k, atol=2e-3, rtol=2e-3), "mismatch vs kernel-math reference"

    # Semantic sanity check vs the exact f32 torch-module math; looser tolerance is the
    # expected effect of feeding the MXU bf16 operands (f32 accumulation).
    ref_f32 = fc_encoder_reference_f32(params, x)
    assert jnp.allclose(out, ref_f32, atol=1e-1, rtol=1e-1), "mismatch vs f32 module reference"

    print("KERNEL_OK")
</pallas_src>

<mosaic_0001>
module attributes {stable_mosaic.version = 11 : i64} {
  func.func @kernel(%arg0: memref<8x128xbf16, #tpu.memory_space<vmem>>, %arg1: memref<128x128xbf16, #tpu.memory_space<vmem>>, %arg2: memref<3x128xf32, #tpu.memory_space<vmem>>, %arg3: memref<128x128xbf16, #tpu.memory_space<vmem>>, %arg4: memref<3x128xf32, #tpu.memory_space<vmem>>, %arg5: memref<128x128xbf16, #tpu.memory_space<vmem>>, %arg6: memref<1x128xf32, #tpu.memory_space<vmem>>, %arg7: memref<8x128xf32, #tpu.memory_space<vmem>>) attributes {dimension_semantics = [], scalar_prefetch = 0 : i64, scratch_operands = 0 : i64, tpu.core_type = #tpu.core_type<tc>} {
    %c0 = arith.constant 0 : index
    %c0_0 = arith.constant 0 : index
    %0 = vector.load %arg0[%c0, %c0_0] : memref<8x128xbf16, #tpu.memory_space<vmem>>, vector<8x128xbf16>
    %c0_1 = arith.constant 0 : index
    %c0_2 = arith.constant 0 : index
    %1 = vector.load %arg1[%c0_1, %c0_2] : memref<128x128xbf16, #tpu.memory_space<vmem>>, vector<128x128xbf16>
    %cst = arith.constant dense<0.000000e+00> : vector<8x128xf32>
    %2 = tpu.matmul %0, %1, %cst {dimension_numbers = #tpu.dot_dimension_numbers<[1], [0], [0], [1], [0, 0, 1, 1], [], []>} : vector<8x128xbf16>, vector<128x128xbf16>, vector<8x128xf32> -> vector<8x128xf32>
    %c0_3 = arith.constant 0 : index
    %c0_4 = arith.constant 0 : index
    %3 = vector.load %arg2[%c0_3, %c0_4] : memref<3x128xf32, #tpu.memory_space<vmem>>, vector<3x128xf32>
    %4 = vector.extract_strided_slice %3 {offsets = [0, 0], sizes = [1, 128], strides = [1, 1]} : vector<3x128xf32> to vector<1x128xf32>
    %5 = vector.broadcast %4 : vector<1x128xf32> to vector<8x128xf32>
    %6 = arith.addf %2, %5 : vector<8x128xf32>
    %cst_5 = arith.constant dense<0.000000e+00> : vector<128xf32>
    %7 = vector.multi_reduction <add>, %6, %cst_5 [0] : vector<8x128xf32> to vector<128xf32>
    %8 = vector.shape_cast %7 : vector<128xf32> to vector<1x128xf32>
    %cst_6 = arith.constant 8.000000e+00 : f32
    %9 = vector.broadcast %cst_6 : f32 to vector<1x128xf32>
    %10 = arith.divf %8, %9 : vector<1x128xf32>
    %11 = arith.mulf %6, %6 : vector<8x128xf32>
    %cst_7 = arith.constant dense<0.000000e+00> : vector<128xf32>
    %12 = vector.multi_reduction <add>, %11, %cst_7 [0] : vector<8x128xf32> to vector<128xf32>
    %13 = vector.shape_cast %12 : vector<128xf32> to vector<1x128xf32>
    %cst_8 = arith.constant 8.000000e+00 : f32
    %14 = vector.broadcast %cst_8 : f32 to vector<1x128xf32>
    %15 = arith.divf %13, %14 : vector<1x128xf32>
    %16 = arith.mulf %10, %10 : vector<1x128xf32>
    %17 = arith.subf %15, %16 : vector<1x128xf32>
    %18 = vector.extract_strided_slice %3 {offsets = [1, 0], sizes = [1, 128], strides = [1, 1]} : vector<3x128xf32> to vector<1x128xf32>
    %cst_9 = arith.constant 9.99999974E-6 : f32
    %19 = vector.broadcast %cst_9 : f32 to vector<1x128xf32>
    %20 = arith.addf %17, %19 : vector<1x128xf32>
    %21 = math.rsqrt %20 : vector<1x128xf32>
    %22 = arith.mulf %18, %21 : vector<1x128xf32>
    %23 = vector.extract_strided_slice %3 {offsets = [2, 0], sizes = [1, 128], strides = [1, 1]} : vector<3x128xf32> to vector<1x128xf32>
    %24 = arith.mulf %10, %22 : vector<1x128xf32>
    %25 = arith.subf %23, %24 : vector<1x128xf32>
    %26 = vector.broadcast %22 : vector<1x128xf32> to vector<8x128xf32>
    %27 = arith.mulf %6, %26 : vector<8x128xf32>
    %28 = vector.broadcast %25 : vector<1x128xf32> to vector<8x128xf32>
    %29 = arith.addf %27, %28 : vector<8x128xf32>
    %cst_10 = arith.constant 0.000000e+00 : f32
    %30 = vector.broadcast %cst_10 : f32 to vector<8x128xf32>
    %31 = arith.maximumf %29, %30 : vector<8x128xf32>
    %32 = arith.truncf %31 : vector<8x128xf32> to vector<8x128xbf16>
    %c0_11 = arith.constant 0 : index
    %c0_12 = arith.constant 0 : index
    %33 = vector.load %arg3[%c0_11, %c0_12] : memref<128x128xbf16, #tpu.memory_space<vmem>>, vector<128x128xbf16>
    %cst_13 = arith.constant dense<0.000000e+00> : vector<8x128xf32>
    %34 = tpu.matmul %32, %33, %cst_13 {dimension_numbers = #tpu.dot_dimension_numbers<[1], [0], [0], [1], [0, 0, 1, 1], [], []>} : vector<8x128xbf16>, vector<128x128xbf16>, vector<8x128xf32> -> vector<8x128xf32>
    %c0_14 = arith.constant 0 : index
    %c0_15 = arith.constant 0 : index
    %35 = vector.load %arg4[%c0_14, %c0_15] : memref<3x128xf32, #tpu.memory_space<vmem>>, vector<3x128xf32>
    %36 = vector.extract_strided_slice %35 {offsets = [0, 0], sizes = [1, 128], strides = [1, 1]} : vector<3x128xf32> to vector<1x128xf32>
    %37 = vector.broadcast %36 : vector<1x128xf32> to vector<8x128xf32>
    %38 = arith.addf %34, %37 : vector<8x128xf32>
    %cst_16 = arith.constant dense<0.000000e+00> : vector<128xf32>
    %39 = vector.multi_reduction <add>, %38, %cst_16 [0] : vector<8x128xf32> to vector<128xf32>
    %40 = vector.shape_cast %39 : vector<128xf32> to vector<1x128xf32>
    %cst_17 = arith.constant 8.000000e+00 : f32
    %41 = vector.broadcast %cst_17 : f32 to vector<1x128xf32>
    %42 = arith.divf %40, %41 : vector<1x128xf32>
    %43 = arith.mulf %38, %38 : vector<8x128xf32>
    %cst_18 = arith.constant dense<0.000000e+00> : vector<128xf32>
    %44 = vector.multi_reduction <add>, %43, %cst_18 [0] : vector<8x128xf32> to vector<128xf32>
    %45 = vector.shape_cast %44 : vector<128xf32> to vector<1x128xf32>
    %cst_19 = arith.constant 8.000000e+00 : f32
    %46 = vector.broadcast %cst_19 : f32 to vector<1x128xf32>
    %47 = arith.divf %45, %46 : vector<1x128xf32>
    %48 = arith.mulf %42, %42 : vector<1x128xf32>
    %49 = arith.subf %47, %48 : vector<1x128xf32>
    %50 = vector.extract_strided_slice %35 {offsets = [1, 0], sizes = [1, 128], strides = [1, 1]} : vector<3x128xf32> to vector<1x128xf32>
    %cst_20 = arith.constant 9.99999974E-6 : f32
    %51 = vector.broadcast %cst_20 : f32 to vector<1x128xf32>
    %52 = arith.addf %49, %51 : vector<1x128xf32>
    %53 = math.rsqrt %52 : vector<1x128xf32>
    %54 = arith.mulf %50, %53 : vector<1x128xf32>
    %55 = vector.extract_strided_slice %35 {offsets = [2, 0], sizes = [1, 128], strides = [1, 1]} : vector<3x128xf32> to vector<1x128xf32>
    %56 = arith.mulf %42, %54 : vector<1x128xf32>
    %57 = arith.subf %55, %56 : vector<1x128xf32>
    %58 = vector.broadcast %54 : vector<1x128xf32> to vector<8x128xf32>
    %59 = arith.mulf %38, %58 : vector<8x128xf32>
    %60 = vector.broadcast %57 : vector<1x128xf32> to vector<8x128xf32>
    %61 = arith.addf %59, %60 : vector<8x128xf32>
    %cst_21 = arith.constant 0.000000e+00 : f32
    %62 = vector.broadcast %cst_21 : f32 to vector<8x128xf32>
    %63 = arith.maximumf %61, %62 : vector<8x128xf32>
    %64 = arith.truncf %63 : vector<8x128xf32> to vector<8x128xbf16>
    %c0_22 = arith.constant 0 : index
    %c0_23 = arith.constant 0 : index
    %65 = vector.load %arg5[%c0_22, %c0_23] : memref<128x128xbf16, #tpu.memory_space<vmem>>, vector<128x128xbf16>
    %cst_24 = arith.constant dense<0.000000e+00> : vector<8x128xf32>
    %66 = tpu.matmul %64, %65, %cst_24 {dimension_numbers = #tpu.dot_dimension_numbers<[1], [0], [0], [1], [0, 0, 1, 1], [], []>} : vector<8x128xbf16>, vector<128x128xbf16>, vector<8x128xf32> -> vector<8x128xf32>
    %c0_25 = arith.constant 0 : index
    %c0_26 = arith.constant 0 : index
    %67 = vector.load %arg6[%c0_25, %c0_26] : memref<1x128xf32, #tpu.memory_space<vmem>>, vector<1x128xf32>
    %68 = vector.broadcast %67 : vector<1x128xf32> to vector<8x128xf32>
    %69 = arith.addf %66, %68 : vector<8x128xf32>
    %c0_27 = arith.constant 0 : index
    %c0_28 = arith.constant 0 : index
    %70 = vector.load %arg7[%c0_27, %c0_28] : memref<8x128xf32, #tpu.memory_space<vmem>>, vector<8x128xf32>
    tpu.vector_store %arg7[%c0_27, %c0_28], %69 {strides = array<i32>} : memref<8x128xf32, #tpu.memory_space<vmem>>, vector<8x128xf32>,
    return
  }
}

</mosaic_0001>

<bundles_post_ra>
// kernel: tpu_custom_call.1
= control target key start
LH: loop header
LB: loop body
LE: loop exit
PB: predicated region body
PF: predicated region fallthrough
CT: control target
= control target key end

     0   :  { %12 = vsyncpa [#allocation3], 0  ;;  %s923_s0 = inlined_call_operand.hbm [shape: bf16[8,128], index: 0, kind: input, shape index: {}]   ;;  %s924_s1 = inlined_call_operand.hbm [shape: bf16[128,128], index: 1, kind: input, shape index: {}]   ;;  %s925_s2 = inlined_call_operand.hbm [shape: f32[3,128], index: 2, kind: input, shape index: {}]   ;;  %s926_s3 = inlined_call_operand.hbm [shape: bf16[128,128], index: 3, kind: input, shape index: {}]   ;;  %s927_s4 = inlined_call_operand.vmem [shape: f32[3,128], index: 4, kind: input, shape index: {}]   ;;  %s928_s5 = inlined_call_operand.hbm [shape: bf16[128,128], index: 5, kind: input, shape index: {}]   ;;  %s929_s6 = inlined_call_operand.vmem [shape: f32[1,128], index: 6, kind: input, shape index: {}]   ;;  %s930_s7 = inlined_call_operand.hbm [shape: f32[8,128], index: 7, kind: output, shape index: {}]  }
   0x1   :  { %13 = vsyncpa [#allocation6], 0 }
   0x2   :  { %14 = vsyncpa [#allocation9], 0 }
   0x3   :  { %15 = vsyncpa [#allocation4], 0  ;;  %s793_s24 = smov [#allocation5]  }
   0x4   :  { %s31_s25 = sshll.u32 %s793_s24, 4  ;;  %s32_s25 = int_to_ptr.vmem [resolvable:$true] %s31_s25 }
   0x5   :  { %s673_s26 = scalar_lea.vmem %s32_s25, 1024  ;;  %p678_p1 = scmp.lt.s32.totalorder %s32_s25, %s32_s25 }
   0x6   :  { %p674_p0 = scmp.ne.s32.totalorder %s32_s25, %s673_s26  ;;  %p679_p2 = scmp.lt.s32.totalorder %s673_s26, %s673_s26 }
   0x8   :  { %p680_p3 = por %p679_p2, %p678_p1 }
   0xa   :  { %p681_p4 = pnand %p680_p3, %p674_p0 }
   0xc   :  { %684 = shalt.err (!%p681_p4)
}
   0xd   :  { %s794_s27 = smov 64   ;;  %s795_s28 = smov 4  }
   0xe   :  { %37 = dma.hbm_to_vmem [thread:$0]  %s924_s1, 1024, %s32_s25, [#allocation6], %s794_s27, %s794_s27, %s795_s28  }
   0xf   :  { %s796_s8 = smov [#allocation8]   ;;  %s797_s10 = smov [#allocation2]  }
  0x10   :  { %s53_s9 = sshll.u32 %s796_s8, 4  ;;  %s22_s11 = sshll.u32 %s797_s10, 4  ;;  %s54_s9 = int_to_ptr.vmem [resolvable:$true] %s53_s9  ;;  %s23_s11 = int_to_ptr.vmem [resolvable:$true] %s22_s11 }
  0x11   :  { %s693_s12 = scalar_lea.vmem %s54_s9, 1024  ;;  %p698_p6 = scmp.lt.s32.totalorder %s54_s9, %s54_s9 }
  0x12   :  { %p694_p5 = scmp.ne.s32.totalorder %s54_s9, %s693_s12  ;;  %p699_p7 = scmp.lt.s32.totalorder %s693_s12, %s693_s12 }
  0x14   :  { %p700_p8 = por %p699_p7, %p698_p6 }
  0x16   :  { %p701_p9 = pnand %p700_p8, %p694_p5 }
  0x18   :  { %704 = shalt.err (!%p701_p9)
}
  0x19   :  { %59 = dma.hbm_to_vmem [thread:$0]  %s926_s3, 1024, %s54_s9, [#allocation9], %s794_s27, %s794_s27, %s795_s28  }
  0x1a   :  { %s713_s1 = scalar_lea.vmem %s23_s11, 64  ;;  %p718_p11 = scmp.lt.s32.totalorder %s23_s11, %s23_s11 }
  0x1b   :  { %p714_p10 = scmp.ne.s32.totalorder %s23_s11, %s713_s1  ;;  %p719_p12 = scmp.lt.s32.totalorder %s713_s1, %s713_s1 }
  0x1d   :  { %p720_p13 = por %p719_p12, %p718_p11 }
  0x1f   :  { %p721_p0 = pnand %p720_p13, %p714_p10 }
  0x21   :  { %724 = shalt.err (!%p721_p0)
}
  0x22   :  { %25 = dma.hbm_to_vmem [thread:$0]  %s923_s0, 64, %s23_s11, [#allocation3]  }
  0x23   :  { %s798_s17 = smov [#allocation7]   ;;  %s799_s19 = smov [#allocation10]  }
  0x24   :  { %s44_s18 = sshll.u32 %s798_s17, 4  ;;  %s67_s20 = sshll.u32 %s799_s19, 4  ;;  %s45_s18 = int_to_ptr.vmem [resolvable:$true] %s44_s18  ;;  %s68_s20 = int_to_ptr.vmem [resolvable:$true] %s67_s20 }
  0x25   :  { %s733_s21 = scalar_lea.vmem %s45_s18, 64  ;;  %p738_p2 = scmp.lt.s32.totalorder %s45_s18, %s45_s18 }
  0x26   :  { %p734_p1 = scmp.ne.s32.totalorder %s45_s18, %s733_s21  ;;  %p739_p3 = scmp.lt.s32.totalorder %s733_s21, %s733_s21 }
  0x28   :  { %p740_p4 = por %p739_p3, %p738_p2 }
  0x2a   :  { %p741_p5 = pnand %p740_p4, %p734_p1 }
  0x2c   :  { %744 = shalt.err (!%p741_p5)
}
  0x2d   :  { %47 = dma.hbm_to_vmem [thread:$0]  %s925_s2, 64, %s45_s18, [#allocation6]  }
  0x2e   :  { %s753_s23 = scalar_lea.vmem %s68_s20, 1024  ;;  %p758_p7 = scmp.lt.s32.totalorder %s68_s20, %s68_s20 }
  0x2f   :  { %p754_p6 = scmp.ne.s32.totalorder %s68_s20, %s753_s23  ;;  %p759_p8 = scmp.lt.s32.totalorder %s753_s23, %s753_s23 }
  0x31   :  { %p760_p9 = por %p759_p8, %p758_p7 }
  0x33   :  { %p761_p10 = pnand %p760_p9, %p754_p6 }
  0x35   :  { %764 = shalt.err (!%p761_p10)
}
  0x36   :  { %73 = dma.hbm_to_vmem [thread:$0]  %s928_s5, 1024, %s68_s20, [#allocation9], %s794_s27, %s794_s27, %s795_s28  }
  0x37   :  { %785 = dma.done.wait [#allocation3], 64  }
  0x38   :  { %786 = vsyncadd [#allocation3], 4294967232 }
  0x39   :  { %787 = dma.done.wait [#allocation6], 1088  }
  0x3a   :  { %788 = vsyncadd [#allocation6], 4294966208 }
  0x3b   :  { %789 = dma.done.wait [#allocation9], 2048  }
  0x3c   :  { %790 = vsyncadd [#allocation9], 4294965248  ;;  %v800_v0 = vmov 0.0   ;;  %vm801_vm0 = vmmov 0   ;;  %v637_v1 = vld [vmem:[#allocation5 + $0x38] sm:$0xff]   ;;  %v638_v2 = vld [vmem:[#allocation5 + $0x30] sm:$0xff]   ;;  %v110_v18 = vlaneseq }
  0x3d   :  { %567 = vmatprep.subr.bf16.mxu0 %v800_v0  ;;  %583 = vmatprep.mubr.msk.bf16.mxu0 %vm801_vm0, %v800_v0  ;;  %v639_v3 = vld [vmem:[#allocation5 + $0x28] sm:$0xff]   ;;  %v640_v4 = vld [vmem:[#allocation5 + $0x20] sm:$0xff]   ;;  %v641_v5 = vld [vmem:[#allocation5 + $0x18] sm:$0xff]   ;;  %s802_s26 = smov [#allocation11]  }
  0x3e   :  { %587 = vmatprep.subr.bf16.mxu1 %v800_v0  ;;  %603 = vmatprep.mubr.msk.bf16.mxu1 %vm801_vm0, %v800_v0  ;;  %v642_v6 = vld [vmem:[#allocation5 + $0x10] sm:$0xff]   ;;  %v643_v7 = vld [vmem:[#allocation5 + $0x8] sm:$0xff]   ;;  %v644_v8 = vld [vmem:[#allocation5] sm:$0xff]   ;;  %v890_v19 = vshrl.u32 %v110_v18, 7  ;;  %s504_s27 = sshll.u32 %s802_s26, 4  ;;  %s505_s27 = int_to_ptr.vmem [resolvable:$true] %s504_s27 }
  0x3f   :  { %568 = vmatpush3.bf16.msra.mxu0 %v637_v1  ;;  %v92_v9 = vld [vmem:[#allocation2] sm:$0xf]  ;;  %v646_v11 = vld [vmem:[#allocation8 + $0x30] sm:$0xff]   ;;  %v647_v12 = vld [vmem:[#allocation8 + $0x28] sm:$0xff]   ;;  %s765_s28 = scalar_lea.vmem %s505_s27, 128  ;;  %p770_p12 = scmp.lt.s32.totalorder %s505_s27, %s505_s27 }
  0x40   :  { %569 = vmatprep.subr.bf16.mxu0 %v800_v0  ;;  %v645_v10 = vld [vmem:[#allocation8 + $0x38] sm:$0xff]   ;;  %v648_v13 = vld [vmem:[#allocation8 + $0x20] sm:$0xff]   ;;  %v650_v15 = vld [vmem:[#allocation8 + $0x10] sm:$0xff]   ;;  %v112_v20 = vsub.s32 0, %v890_v19  ;;  %v230_v48 = vsub.s32 1, %v890_v19  ;;  %v235_v52 = vsub.s32 2, %v890_v19  ;;  %p766_p11 = scmp.ne.s32.totalorder %s505_s27, %s765_s28  ;;  %p771_p13 = scmp.lt.s32.totalorder %s765_s28, %s765_s28 }
  0x41   :  { %588 = vmatpush3.bf16.msra.mxu1 %v645_v10  ;;  %v649_v14 = vld [vmem:[#allocation8 + $0x18] sm:$0xff]   ;;  %v651_v16 = vld [vmem:[#allocation8 + $0x8] sm:$0xff]   ;;  %v652_v17 = vld [vmem:[#allocation8] sm:$0xff]  }
  0x42   :  { %589 = vmatprep.subr.bf16.mxu1 %v800_v0  ;;  %v109_v21 = vld [vmem:[#allocation7] sm:$0x7]  ;;  %v654_v60 = vld [vmem:[#allocation10 + $0x30] sm:$0xff]   ;;  %v655_v61 = vld [vmem:[#allocation10 + $0x28] sm:$0xff]   ;;  %p772_p0 = por %p771_p13, %p770_p12 }
  0x43   :  { %570 = vmatpush3.bf16.msra.mxu0 %v638_v2  ;;  %v113_v22 = vrot.slane %v109_v21, %v112_v20  ;;  %v653_v59 = vld [vmem:[#allocation10 + $0x38] sm:$0xff]   ;;  %v656_v62 = vld [vmem:[#allocation10 + $0x20] sm:$0xff]   ;;  %v658_v1 = vld [vmem:[#allocation10 + $0x10] sm:$0xff]  }
  0x44   :  { %571 = vmatprep.subr.bf16.mxu0 %v800_v0  ;;  %v657_v63 = vld [vmem:[#allocation10 + $0x18] sm:$0xff]   ;;  %v659_v2 = vld [vmem:[#allocation10 + $0x8] sm:$0xff]   ;;  %p773_p1 = pnand %p772_p0, %p766_p11 }
  0x45   :  { %590 = vmatpush3.bf16.msra.mxu1 %v646_v11 }
  0x46   :  { %591 = vmatprep.subr.bf16.mxu1 %v800_v0 }
  0x47   :  { %572 = vmatpush3.bf16.msra.mxu0 %v639_v3  ;;  %v660_v3 = vld [vmem:[#allocation10] sm:$0xff]  }
  0x48   :  { %573 = vmatprep.subr.bf16.mxu0 %v800_v0 }
  0x49   :  { %592 = vmatpush3.bf16.msra.mxu1 %v647_v12 }
  0x4a   :  { %593 = vmatprep.subr.bf16.mxu1 %v800_v0 }
  0x4b   :  { %574 = vmatpush3.bf16.msra.mxu0 %v640_v4  ;;  %v256_v4 = vld [vmem:[%s927_s4] sm:$0x7] }
  0x4c   :  { %575 = vmatprep.subr.bf16.mxu0 %v800_v0 }
  0x4d   :  { %594 = vmatpush3.bf16.msra.mxu1 %v648_v13 }
  0x4e   :  { %595 = vmatprep.subr.bf16.mxu1 %v800_v0 }
  0x4f   :  { %576 = vmatpush3.bf16.msra.mxu0 %v641_v5  ;;  %v260_v5 = vrot.slane %v256_v4, %v112_v20 }
  0x50   :  { %577 = vmatprep.subr.bf16.mxu0 %v800_v0 }
  0x51   :  { %596 = vmatpush3.bf16.msra.mxu1 %v649_v14 }
  0x52   :  { %597 = vmatprep.subr.bf16.mxu1 %v800_v0 }
  0x53   :  { %578 = vmatpush3.bf16.msra.mxu0 %v642_v6 }
  0x54   :  { %579 = vmatprep.subr.bf16.mxu0 %v800_v0 }
  0x55   :  { %598 = vmatpush3.bf16.msra.mxu1 %v650_v15 }
  0x56   :  { %599 = vmatprep.subr.bf16.mxu1 %v800_v0 }
  0x57   :  { %580 = vmatpush3.bf16.msra.mxu0 %v643_v7 }
  0x58   :  { %581 = vmatprep.subr.bf16.mxu0 %v800_v0 }
  0x59   :  { %600 = vmatpush3.bf16.msra.mxu1 %v651_v16 }
  0x5a   :  { %601 = vmatprep.subr.bf16.mxu1 %v800_v0 }
  0x5b   :  { %582 = vmatpush3.bf16.msra.mxu0 %v644_v8 }
  0x5c   :  { %607 = vmatprep.subr.bf16.mxu0 %v800_v0 }
  0x5d   :  { %602 = vmatpush3.bf16.msra.mxu1 %v652_v17 }
  0x5e   :  { %584 = vmatmul.mubr.bf16.vlgmr.msra.gmra.mxu0 %v92_v9 }
  0x5f   :  { %623 = vmatprep.mubr.msk.bf16.mxu0 %vm801_vm0, %v800_v0  ;;  %608 = vmatpush3.bf16.msra.mxu0 %v653_v59 }
  0x60   :  { %609 = vmatprep.subr.bf16.mxu0 %v800_v0 }
  0x63   :  { %610 = vmatpush3.bf16.msra.mxu0 %v654_v60 }
  0x64   :  { %611 = vmatprep.subr.bf16.mxu0 %v800_v0 }
  0x67   :  { %612 = vmatpush3.bf16.msra.mxu0 %v655_v61 }
  0x68   :  { %613 = vmatprep.subr.bf16.mxu0 %v800_v0 }
  0x6b   :  { %614 = vmatpush3.bf16.msra.mxu0 %v656_v62 }
  0x6c   :  { %615 = vmatprep.subr.bf16.mxu0 %v800_v0 }
  0x6f   :  { %616 = vmatpush3.bf16.msra.mxu0 %v657_v63 }
  0x70   :  { %617 = vmatprep.subr.bf16.mxu0 %v800_v0 }
  0x73   :  { %618 = vmatpush3.bf16.msra.mxu0 %v658_v1 }
  0x74   :  { %619 = vmatprep.subr.bf16.mxu0 %v800_v0 }
  0x77   :  { %620 = vmatpush3.bf16.msra.mxu0 %v659_v2 }
  0x78   :  { %621 = vmatprep.subr.bf16.mxu0 %v800_v0 }
  0x7b   :  { %622 = vmatpush3.bf16.msra.mxu0 %v660_v3 }
 0x11e   :  { %v196_v23 = vpop.f32.mrf.mxu0 }
 0x11f   :  { %v197_v24 = vadd.f32 %v196_v23, %v113_v22 }
 0x120   :  { %v585_v25 = vpop.f32.mrf.mxu0 }
 0x121   :  { %v202_v26 = vrot.slane %v197_v24, 4  ;;  %v210_v27 = vmul.f32 %v197_v24, %v197_v24 }
 0x122   :  { %v199_v28 = vpop.f32.mrf.mxu0 }
 0x123   :  { %v203_v29 = vadd.f32 %v202_v26, %v197_v24  ;;  %v211_v30 = vrot.slane %v210_v27, 4 }
 0x124   :  { %v586_v31 = vpop.f32.mrf.mxu0 }
 0x125   :  { %v204_v32 = vrot.slane %v203_v29, 2  ;;  %v212_v33 = vadd.f32 %v211_v30, %v210_v27 }
 0x127   :  { %v205_v34 = vadd.f32 %v204_v32, %v203_v29  ;;  %v213_v35 = vrot.slane %v212_v33, 2 }
 0x129   :  { %v206_v36 = vrot.slane %v205_v34, 1  ;;  %v214_v37 = vadd.f32 %v213_v35, %v212_v33 }
 0x12b   :  { %v207_v38 = vadd.f32 %v206_v36, %v205_v34  ;;  %v215_v39 = vrot.slane %v214_v37, 1 }
 0x12d   :  { %v209_v40 = vmul.f32 0.125, %v207_v38  ;;  %v216_v41 = vadd.f32 %v215_v39, %v214_v37 }
 0x12f   :  { %v217_v42 = vmul.f32 0.125, %v216_v41  ;;  %v218_v43 = vmul.f32 %v209_v40, %v209_v40 }
 0x131   :  { %v219_v44 = vsub.f32 %v217_v42, %v218_v43 }
 0x133   :  { %v220_v45 = vadd.f32 1e-05, %v219_v44 }
 0x135   :  { %661 = vrsqrt.f32 %v220_v45 }
 0x142   :  { %v662_v46 = vpop.eup %661 }
 0x143   :  { %v222_v47 = vmul.f32 %v662_v46, %v109_v21 }
 0x145   :  { %v223_v49 = vmul.f32 %v222_v47, %v209_v40  ;;  %v231_v51 = vrot.slane %v222_v47, %v230_v48  ;;  %v531_v40 = vld [vmem:[%s929_s6] ss:$0 sm:$0xff] }
 0x147   :  { %v225_v50 = vrot.slane %v223_v49, 7  ;;  %v232_v54 = vmul.f32 %v231_v51, %v197_v24 }
 0x149   :  { %v227_v53 = vsub.f32 %v109_v21, %v225_v50 }
 0x14b   :  { %v236_v55 = vrot.slane %v227_v53, %v235_v52 }
 0x14d   :  { %v237_v56 = vadd.f32 %v236_v55, %v232_v54 }
 0x14f   :  { %v238_v57 = vmax.f32 %v237_v56, 0.0 }
 0x151   :  { %v239_v58 = vpack.c.bf16 %v238_v57, %v238_v57 }
 0x153   :  { %604 = vmatmul.mubr.bf16.vlgmr.msra.gmra.mxu1 %v239_v58 }
 0x213   :  { %v343_v6 = vpop.f32.mrf.mxu1 }
 0x214   :  { %v344_v7 = vadd.f32 %v343_v6, %v260_v5 }
 0x215   :  { %v605_v8 = vpop.f32.mrf.mxu1 }
 0x216   :  { %v349_v9 = vrot.slane %v344_v7, 4  ;;  %v356_v10 = vmul.f32 %v344_v7, %v344_v7 }
 0x217   :  { %v346_v11 = vpop.f32.mrf.mxu1 }
 0x218   :  { %v350_v12 = vadd.f32 %v349_v9, %v344_v7  ;;  %v357_v13 = vrot.slane %v356_v10, 4 }
 0x219   :  { %v606_v14 = vpop.f32.mrf.mxu1 }
 0x21a   :  { %v351_v15 = vrot.slane %v350_v12, 2  ;;  %v358_v16 = vadd.f32 %v357_v13, %v356_v10 }
 0x21c   :  { %v352_v0 = vadd.f32 %v351_v15, %v350_v12  ;;  %v359_v17 = vrot.slane %v358_v16, 2 }
 0x21e   :  { %v353_v18 = vrot.slane %v352_v0, 1  ;;  %v360_v21 = vadd.f32 %v359_v17, %v358_v16 }
 0x220   :  { %v354_v22 = vadd.f32 %v353_v18, %v352_v0  ;;  %v361_v23 = vrot.slane %v360_v21, 1 }
 0x222   :  { %v355_v24 = vmul.f32 0.125, %v354_v22  ;;  %v362_v25 = vadd.f32 %v361_v23, %v360_v21 }
 0x224   :  { %v363_v20 = vmul.f32 0.125, %v362_v25  ;;  %v364_v26 = vmul.f32 %v355_v24, %v355_v24 }
 0x226   :  { %v365_v27 = vsub.f32 %v363_v20, %v364_v26 }
 0x228   :  { %v366_v28 = vadd.f32 1e-05, %v365_v27 }
 0x22a   :  { %663 = vrsqrt.f32 %v366_v28 }
 0x237   :  { %v664_v29 = vpop.eup %663 }
 0x238   :  { %v368_v30 = vmul.f32 %v664_v29, %v256_v4 }
 0x23a   :  { %v369_v31 = vmul.f32 %v368_v30, %v355_v24  ;;  %v377_v33 = vrot.slane %v368_v30, %v230_v48 }
 0x23c   :  { %v371_v32 = vrot.slane %v369_v31, 7  ;;  %v378_v35 = vmul.f32 %v377_v33, %v344_v7 }
 0x23e   :  { %v373_v34 = vsub.f32 %v256_v4, %v371_v32 }
 0x240   :  { %v382_v36 = vrot.slane %v373_v34, %v235_v52 }
 0x242   :  { %v383_v37 = vadd.f32 %v382_v36, %v378_v35 }
 0x244   :  { %v384_v38 = vmax.f32 %v383_v37, 0.0 }
 0x246   :  { %v385_v39 = vpack.c.bf16 %v384_v38, %v384_v38 }
 0x248   :  { %624 = vmatmul.mubr.bf16.vlgmr.msra.gmra.mxu0 %v385_v39 }
 0x308   :  { %v491_v41 = vpop.f32.mrf.mxu0 }
 0x309   :  { %v492_v42 = vadd.f32 %v531_v40, %v491_v41 }
 0x30a   :  { %v625_v43 = vpop.f32.mrf.mxu0 }
 0x30b   :  { %497 = vst [vmem:[#allocation11] sm:$0xff] %v492_v42 }
 0x30c   :  { %v494_v44 = vpop.f32.mrf.mxu0 }
 0x30d   :  { %776 = shalt.err (!%p773_p1)
}
 0x30e   :  { %507 = dma.vmem_to_hbm [thread:$0]  %s505_s27, 128, %s930_s7, [#allocation4]   ;;  %v626_v19 = vpop.f32.mrf.mxu0 }
 0x30f   :  { %791 = dma.done.wait [#allocation4], 128  }
 0x310   :  { %792 = vsyncadd [#allocation4], 4294967168 }
 0x311   :  { %511 = vsyncpa [#allocation3], 1 }
 0x312   :  { %512 = vsyncpa [#allocation6], 1 }
 0x313   :  { %513 = vsyncpa [#allocation9], 1 }
 0x314   :  { %514 = vsyncpa [#allocation4], 1 }

</bundles_post_ra>
